<compile_context>
chip_gen: v6e
topology: v6e:2x2x1
jax: 0.10.0
libtpu: 0.0.40
codegen_flags: <defaults>
</compile_context>

<pallas_src>
import jax
import jax.numpy as jnp
from jax.experimental import pallas as pl
from jax.experimental.pallas import tpu as pltpu

IN_DIM = 1024
H1 = 512
H2 = 256
NUM_CLASSES = 16
BATCH = 8
BN_EPS = 1e-5
TK = 256  # K-tile over IN_DIM for streaming w1 / x


def _head_kernel(x_ref, w1_ref, b1_ref, w2_ref, b2_ref, w3_ref, b3_ref,
                 o_ref, h1_acc):
    k = pl.program_id(0)

    @pl.when(k == 0)
    def _():
        h1_acc[...] = jnp.zeros_like(h1_acc)

    # fc1 partial product: (B, TK) @ (TK, H1), accumulated in f32 VMEM scratch.
    xk = x_ref[...].astype(jnp.bfloat16)
    h1_acc[...] += jnp.dot(xk, w1_ref[...], preferred_element_type=jnp.float32)

    @pl.when(k == pl.num_programs(0) - 1)
    def _():
        # Folded (bias + BN) epilogue + relu; dropout is identity in eval mode.
        h1 = jnp.maximum(h1_acc[...] + b1_ref[...], 0.0)

        # fc2 (+ folded bias/BN) + relu
        h2 = jnp.dot(h1.astype(jnp.bfloat16), w2_ref[...],
                     preferred_element_type=jnp.float32)
        h2 = jnp.maximum(h2 + b2_ref[...], 0.0)

        # fc3
        out = jnp.dot(h2.astype(jnp.bfloat16), w3_ref[...],
                      preferred_element_type=jnp.float32)
        o_ref[...] = (out + b3_ref[...]).astype(o_ref.dtype)


def classification_head(x, params):
    """x: (B, 1024) float32 -> (B, NUM_CLASSES) float32."""
    B = x.shape[0]
    (w1, b1, w2, b2, w3, b3) = params
    n_k = IN_DIM // TK

    return pl.pallas_call(
        _head_kernel,
        out_shape=jax.ShapeDtypeStruct((B, NUM_CLASSES), jnp.float32),
        grid_spec=pltpu.PrefetchScalarGridSpec(
            num_scalar_prefetch=0,
            grid=(n_k,),
            in_specs=[
                pl.BlockSpec((B, TK), lambda k: (0, k)),       # x chunk
                pl.BlockSpec((TK, H1), lambda k: (k, 0)),      # w1 chunk (streamed)
                pl.BlockSpec((1, H1), lambda k: (0, 0)),       # folded b1
                pl.BlockSpec((H1, H2), lambda k: (0, 0)),      # w2 (fetched once)
                pl.BlockSpec((1, H2), lambda k: (0, 0)),       # folded b2
                pl.BlockSpec((H2, NUM_CLASSES), lambda k: (0, 0)),  # w3
                pl.BlockSpec((1, NUM_CLASSES), lambda k: (0, 0)),   # b3
            ],
            out_specs=pl.BlockSpec((B, NUM_CLASSES), lambda k: (0, 0)),
            scratch_shapes=[pltpu.VMEM((B, H1), jnp.float32)],  # fc1 accumulator
        ),
        compiler_params=pltpu.CompilerParams(
            dimension_semantics=("arbitrary",)),
    )(x, w1, b1, w2, b2, w3, b3)


def make_params(key):
    """Deterministic synthetic parameters (shapes from the module __init__).

    Returns (kernel_params, raw_f32_params):
      kernel_params: BN/bias folded, weights cast to bf16.
      raw_f32_params: original-form f32 params for the semantic reference.
    """
    ks = jax.random.split(key, 16)

    def linear(kw, kb, fan_in, fan_out):
        bound = 1.0 / jnp.sqrt(fan_in)
        w = jax.random.uniform(kw, (fan_in, fan_out), jnp.float32, -bound, bound)
        b = jax.random.uniform(kb, (1, fan_out), jnp.float32, -bound, bound)
        return w, b

    def bn(kg, kb, km, kv, dim):
        gamma = 1.0 + 0.1 * jax.random.normal(kg, (1, dim), jnp.float32)
        beta = 0.1 * jax.random.normal(kb, (1, dim), jnp.float32)
        mean = 0.1 * jax.random.normal(km, (1, dim), jnp.float32)
        var = jnp.abs(jax.random.normal(kv, (1, dim), jnp.float32)) + 0.5
        # eval-mode BN as per-feature scale/shift
        scale = gamma / jnp.sqrt(var + BN_EPS)
        shift = beta - mean * scale
        return scale, shift

    w1, b1 = linear(ks[0], ks[1], IN_DIM, H1)
    s1, t1 = bn(ks[2], ks[3], ks[4], ks[5], H1)
    w2, b2 = linear(ks[6], ks[7], H1, H2)
    s2, t2 = bn(ks[8], ks[9], ks[10], ks[11], H2)
    w3, b3 = linear(ks[12], ks[13], H2, NUM_CLASSES)

    # Fold bias + eval-mode BN into weights:
    #   relu((x@w + b)*s + t) == relu(x @ (w*s) + (b*s + t))
    w1f = (w1 * s1).astype(jnp.bfloat16)
    b1f = b1 * s1 + t1
    w2f = (w2 * s2).astype(jnp.bfloat16)
    b2f = b2 * s2 + t2
    w3f = w3.astype(jnp.bfloat16)

    kernel_params = (w1f, b1f, w2f, b2f, w3f, b3)
    raw_params = (w1, b1, s1, t1, w2, b2, s2, t2, w3, b3)
    return kernel_params, raw_params


def reference_bf16(x, params):
    """Same math as the kernel (bf16 operands, f32 accumulation) in plain JAX."""
    (w1, b1, w2, b2, w3, b3) = params
    h1 = jnp.maximum(jnp.dot(x.astype(jnp.bfloat16), w1,
                             preferred_element_type=jnp.float32) + b1, 0.0)
    h2 = jnp.maximum(jnp.dot(h1.astype(jnp.bfloat16), w2,
                             preferred_element_type=jnp.float32) + b2, 0.0)
    return jnp.dot(h2.astype(jnp.bfloat16), w3,
                   preferred_element_type=jnp.float32) + b3


def reference_f32(x, raw):
    """Original (un-folded, f32) module semantics."""
    (w1, b1, s1, t1, w2, b2, s2, t2, w3, b3) = raw
    h1 = jnp.maximum((x @ w1 + b1) * s1 + t1, 0.0)
    h2 = jnp.maximum((h1 @ w2 + b2) * s2 + t2, 0.0)
    return h2 @ w3 + b3


if __name__ == "__main__":
    key = jax.random.PRNGKey(0)
    kx, kp = jax.random.split(key)
    x = jax.random.normal(kx, (BATCH, IN_DIM), jnp.float32)
    kernel_params, raw_params = make_params(kp)

    out = classification_head(x, kernel_params)
    out = jax.block_until_ready(out)
    assert out.shape == (BATCH, NUM_CLASSES)

    # Tight check against a plain-JAX model of the exact kernel math.
    ref_q = reference_bf16(x, kernel_params)
    assert jnp.allclose(out, ref_q, atol=1e-3, rtol=1e-3), \
        "mismatch vs bf16 reference"

    # Loose check against the original f32 module semantics
    # (difference is expected bf16 quantization error, not a kernel bug).
    ref_f = reference_f32(x, raw_params)
    assert jnp.allclose(out, ref_f, atol=1e-1, rtol=1e-1), \
        "mismatch vs f32 reference beyond bf16 quantization tolerance"

    print("KERNEL_OK")
</pallas_src>

<mosaic_0001>
module attributes {stable_mosaic.version = 11 : i64} {
  func.func @_head_kernel(%arg0: i32, %arg1: memref<8x256xf32, #tpu.memory_space<vmem>>, %arg2: memref<256x512xbf16, #tpu.memory_space<vmem>>, %arg3: memref<1x512xf32, #tpu.memory_space<vmem>>, %arg4: memref<512x256xbf16, #tpu.memory_space<vmem>>, %arg5: memref<1x256xf32, #tpu.memory_space<vmem>>, %arg6: memref<256x16xbf16, #tpu.memory_space<vmem>>, %arg7: memref<1x16xf32, #tpu.memory_space<vmem>>, %arg8: memref<8x16xf32, #tpu.memory_space<vmem>>, %arg9: memref<8x512xf32, #tpu.memory_space<vmem>>) attributes {dimension_semantics = [#tpu.dimension_semantics<arbitrary>], iteration_bounds = array<i64: 4>, scalar_prefetch = 0 : i64, scratch_operands = 1 : i64, tpu.core_type = #tpu.core_type<tc>, window_params = [{transform_indices = @transform_0, window_bounds = array<i64: 8, 256>}, {transform_indices = @transform_1, window_bounds = array<i64: 256, 512>}, {pipeline_mode = #tpu.pipeline_mode<synchronous>, transform_indices = @transform_2, window_bounds = array<i64: 1, 512>}, {pipeline_mode = #tpu.pipeline_mode<synchronous>, transform_indices = @transform_3, window_bounds = array<i64: 512, 256>}, {pipeline_mode = #tpu.pipeline_mode<synchronous>, transform_indices = @transform_4, window_bounds = array<i64: 1, 256>}, {pipeline_mode = #tpu.pipeline_mode<synchronous>, transform_indices = @transform_5, window_bounds = array<i64: 256, 16>}, {pipeline_mode = #tpu.pipeline_mode<synchronous>, transform_indices = @transform_6, window_bounds = array<i64: 1, 16>}, {pipeline_mode = #tpu.pipeline_mode<synchronous>, transform_indices = @transform_7, window_bounds = array<i64: 8, 16>}]} {
    %c0_i32 = arith.constant 0 : i32
    %0 = arith.cmpi eq, %arg0, %c0_i32 : i32
    %1 = arith.extui %0 : i1 to i32
    %c0_i32_0 = arith.constant 0 : i32
    %2 = arith.cmpi ne, %1, %c0_i32_0 : i32
    scf.if %2 {
      %cst_9 = arith.constant 0.000000e+00 : f32
      %13 = vector.broadcast %cst_9 : f32 to vector<8x512xf32>
      %c0_10 = arith.constant 0 : index
      %c0_11 = arith.constant 0 : index
      %14 = vector.load %arg9[%c0_10, %c0_11] : memref<8x512xf32, #tpu.memory_space<vmem>>, vector<8x512xf32>
      tpu.vector_store %arg9[%c0_10, %c0_11], %13 {strides = array<i32>} : memref<8x512xf32, #tpu.memory_space<vmem>>, vector<8x512xf32>,
    } else {
    }
    %c0 = arith.constant 0 : index
    %c0_1 = arith.constant 0 : index
    %3 = vector.load %arg1[%c0, %c0_1] : memref<8x256xf32, #tpu.memory_space<vmem>>, vector<8x256xf32>
    %4 = arith.truncf %3 : vector<8x256xf32> to vector<8x256xbf16>
    %c0_2 = arith.constant 0 : index
    %c0_3 = arith.constant 0 : index
    %5 = vector.load %arg9[%c0_2, %c0_3] : memref<8x512xf32, #tpu.memory_space<vmem>>, vector<8x512xf32>
    %c0_4 = arith.constant 0 : index
    %c0_5 = arith.constant 0 : index
    %6 = vector.load %arg2[%c0_4, %c0_5] : memref<256x512xbf16, #tpu.memory_space<vmem>>, vector<256x512xbf16>
    %cst = arith.constant dense<0.000000e+00> : vector<8x512xf32>
    %7 = tpu.matmul %4, %6, %cst {dimension_numbers = #tpu.dot_dimension_numbers<[1], [0], [0], [1], [0, 0, 1, 1], [], []>} : vector<8x256xbf16>, vector<256x512xbf16>, vector<8x512xf32> -> vector<8x512xf32>
    %8 = arith.addf %5, %7 : vector<8x512xf32>
    %c0_6 = arith.constant 0 : index
    %c0_7 = arith.constant 0 : index
    %9 = vector.load %arg9[%c0_6, %c0_7] : memref<8x512xf32, #tpu.memory_space<vmem>>, vector<8x512xf32>
    tpu.vector_store %arg9[%c0_6, %c0_7], %8 {strides = array<i32>} : memref<8x512xf32, #tpu.memory_space<vmem>>, vector<8x512xf32>,
    %c3_i32 = arith.constant 3 : i32
    %10 = arith.cmpi eq, %arg0, %c3_i32 : i32
    %11 = arith.extui %10 : i1 to i32
    %c0_i32_8 = arith.constant 0 : i32
    %12 = arith.cmpi ne, %11, %c0_i32_8 : i32
    scf.if %12 {
      %c0_9 = arith.constant 0 : index
      %c0_10 = arith.constant 0 : index
      %13 = vector.load %arg9[%c0_9, %c0_10] : memref<8x512xf32, #tpu.memory_space<vmem>>, vector<8x512xf32>
      %c0_11 = arith.constant 0 : index
      %c0_12 = arith.constant 0 : index
      %14 = vector.load %arg3[%c0_11, %c0_12] : memref<1x512xf32, #tpu.memory_space<vmem>>, vector<1x512xf32>
      %15 = vector.broadcast %14 : vector<1x512xf32> to vector<8x512xf32>
      %16 = arith.addf %13, %15 : vector<8x512xf32>
      %cst_13 = arith.constant 0.000000e+00 : f32
      %17 = vector.broadcast %cst_13 : f32 to vector<8x512xf32>
      %18 = arith.maximumf %16, %17 : vector<8x512xf32>
      %19 = arith.truncf %18 : vector<8x512xf32> to vector<8x512xbf16>
      %c0_14 = arith.constant 0 : index
      %c0_15 = arith.constant 0 : index
      %20 = vector.load %arg4[%c0_14, %c0_15] : memref<512x256xbf16, #tpu.memory_space<vmem>>, vector<512x256xbf16>
      %cst_16 = arith.constant dense<0.000000e+00> : vector<8x256xf32>
      %21 = tpu.matmul %19, %20, %cst_16 {dimension_numbers = #tpu.dot_dimension_numbers<[1], [0], [0], [1], [0, 0, 1, 1], [], []>} : vector<8x512xbf16>, vector<512x256xbf16>, vector<8x256xf32> -> vector<8x256xf32>
      %c0_17 = arith.constant 0 : index
      %c0_18 = arith.constant 0 : index
      %22 = vector.load %arg5[%c0_17, %c0_18] : memref<1x256xf32, #tpu.memory_space<vmem>>, vector<1x256xf32>
      %23 = vector.broadcast %22 : vector<1x256xf32> to vector<8x256xf32>
      %24 = arith.addf %21, %23 : vector<8x256xf32>
      %cst_19 = arith.constant 0.000000e+00 : f32
      %25 = vector.broadcast %cst_19 : f32 to vector<8x256xf32>
      %26 = arith.maximumf %24, %25 : vector<8x256xf32>
      %27 = arith.truncf %26 : vector<8x256xf32> to vector<8x256xbf16>
      %c0_20 = arith.constant 0 : index
      %c0_21 = arith.constant 0 : index
      %28 = vector.load %arg6[%c0_20, %c0_21] : memref<256x16xbf16, #tpu.memory_space<vmem>>, vector<256x16xbf16>
      %cst_22 = arith.constant dense<0.000000e+00> : vector<8x16xf32>
      %29 = tpu.matmul %27, %28, %cst_22 {dimension_numbers = #tpu.dot_dimension_numbers<[1], [0], [0], [1], [0, 0, 1, 1], [], []>} : vector<8x256xbf16>, vector<256x16xbf16>, vector<8x16xf32> -> vector<8x16xf32>
      %c0_23 = arith.constant 0 : index
      %c0_24 = arith.constant 0 : index
      %30 = vector.load %arg7[%c0_23, %c0_24] : memref<1x16xf32, #tpu.memory_space<vmem>>, vector<1x16xf32>
      %31 = vector.broadcast %30 : vector<1x16xf32> to vector<8x16xf32>
      %32 = arith.addf %29, %31 : vector<8x16xf32>
      %c0_25 = arith.constant 0 : index
      %c0_26 = arith.constant 0 : index
      %33 = vector.load %arg8[%c0_25, %c0_26] : memref<8x16xf32, #tpu.memory_space<vmem>>, vector<8x16xf32>
      tpu.vector_store %arg8[%c0_25, %c0_26], %32 {strides = array<i32>} : memref<8x16xf32, #tpu.memory_space<vmem>>, vector<8x16xf32>,
    } else {
    }
    return
  }
  func.func @transform_0(%arg0: i32) -> (i32, i32) {
    %c0_i32 = arith.constant 0 : i32
    %c0_i32_0 = arith.constant 0 : i32
    return %c0_i32, %arg0 : i32, i32
  }
  func.func @transform_1(%arg0: i32) -> (i32, i32) {
    %c0_i32 = arith.constant 0 : i32
    %c0_i32_0 = arith.constant 0 : i32
    return %arg0, %c0_i32 : i32, i32
  }
  func.func @transform_2(%arg0: i32) -> (i32, i32) {
    %c0_i32 = arith.constant 0 : i32
    %c0_i32_0 = arith.constant 0 : i32
    %c0_i32_1 = arith.constant 0 : i32
    return %c0_i32, %c0_i32_0 : i32, i32
  }
  func.func @transform_3(%arg0: i32) -> (i32, i32) {
    %c0_i32 = arith.constant 0 : i32
    %c0_i32_0 = arith.constant 0 : i32
    %c0_i32_1 = arith.constant 0 : i32
    return %c0_i32, %c0_i32_0 : i32, i32
  }
  func.func @transform_4(%arg0: i32) -> (i32, i32) {
    %c0_i32 = arith.constant 0 : i32
    %c0_i32_0 = arith.constant 0 : i32
    %c0_i32_1 = arith.constant 0 : i32
    return %c0_i32, %c0_i32_0 : i32, i32
  }
  func.func @transform_5(%arg0: i32) -> (i32, i32) {
    %c0_i32 = arith.constant 0 : i32
    %c0_i32_0 = arith.constant 0 : i32
    %c0_i32_1 = arith.constant 0 : i32
    return %c0_i32, %c0_i32_0 : i32, i32
  }
  func.func @transform_6(%arg0: i32) -> (i32, i32) {
    %c0_i32 = arith.constant 0 : i32
    %c0_i32_0 = arith.constant 0 : i32
    %c0_i32_1 = arith.constant 0 : i32
    return %c0_i32, %c0_i32_0 : i32, i32
  }
  func.func @transform_7(%arg0: i32) -> (i32, i32) {
    %c0_i32 = arith.constant 0 : i32
    %c0_i32_0 = arith.constant 0 : i32
    %c0_i32_1 = arith.constant 0 : i32
    return %c0_i32, %c0_i32_0 : i32, i32
  }
}

</mosaic_0001>

<bundles_post_ra>
// kernel: tpu_custom_call.1
= control target key start
LH: loop header
LB: loop body
LE: loop exit
PB: predicated region body
PF: predicated region fallthrough
CT: control target
= control target key end

     0   :  { %12 = vsyncpa [#allocation4], 0  ;;  %s2505_s0 = inlined_call_operand.vmem [shape: f32[8,1024], index: 0, kind: input, shape index: {}]   ;;  %s2506_s1 = inlined_call_operand.hbm [shape: bf16[1024,512], index: 1, kind: input, shape index: {}]   ;;  %s2507_s2 = inlined_call_operand.vmem [shape: f32[1,512], index: 2, kind: input, shape index: {}]   ;;  %s2508_s3 = inlined_call_operand.hbm [shape: bf16[512,256], index: 3, kind: input, shape index: {}]   ;;  %s2509_s4 = inlined_call_operand.vmem [shape: f32[1,256], index: 4, kind: input, shape index: {}]   ;;  %s2510_s5 = inlined_call_operand.vmem [shape: bf16[256,16], index: 5, kind: input, shape index: {}]   ;;  %s2511_s6 = inlined_call_operand.vmem [shape: f32[1,16], index: 6, kind: input, shape index: {}]   ;;  %s2512_s7 = inlined_call_operand.hbm [shape: f32[8,16], index: 7, kind: output, shape index: {}]  }
   0x1   :  { %14 = vsyncpa [#allocation4 + $0x1], 0 }
   0x2   :  { %15 = vsyncpa [#allocation7], 0 }
   0x3   :  { %16 = vsyncpa [#allocation5], 0  ;;  %s2223_s24 = smov 0   ;;  %s2225_s25 = smov 0  }
   0x4   :  { %s2227_s26 = smov 0   ;;  %s2229_s27 = smov 0  }
   0x5 LB: > { %s2242_s28 = sadd.s32 4294967295, %s2173_s27   ;;  %p68_p0 = scmp.ne.s32.totalorder %s2165_s25, %s2161_s24  ;;  %s2173_s27 = sphi %s2229_s27, %s2528_s27   ;;  %s2169_s26 = sphi %s2227_s26, %s2527_s26   ;;  %s2165_s25 = sphi %s2225_s25, %s2526_s25   ;;  %s2161_s24 = sphi %s2223_s24, %s2525_s24  }
   0x6   : > { %p2513_p1 = scmp.eq.s32.totalorder %s2242_s28, 0  ;;  %p1596_p2 = scmp.ge.s32.totalorder %s2173_s27, 1 }
   0x7   : > { %p205_p3 = scmp.lt.s32.totalorder %s2173_s27, 5  ;;  %s2175_s8 = smov [#allocation6]  }
   0x8   : > { %p2251_p5 = por %p2513_p1, %p68_p0  ;;  %s220_s9 = sshll.u32 %s2175_s8, 4  ;;  %s221_s9 = int_to_ptr.vmem [resolvable:$true] %s220_s9 }
   0x9   : > { %p2255_p6 = pnand %p1596_p2, %p205_p3  ;;  %s2268_s11 = sadd.s32 1, %s2173_s27  }
   0xa   : > { %s2516_s29 = scalar_select %p2251_p5, 1, 0 }
   0xb   : > { %s2517_s30 = scalar_select %p2255_p6, 1, 0 }
   0xc   : > { %p1793_p7 = pneg %p2255_p6  ;;  %s55_s12 = sadd.s32 1, %s2169_s26 }
   0xd   : > { %s52_s13 = ssub.s32 %s2173_s27, %s2268_s11  ;;  %s2064_s14 = scalar_lea.vmem %s221_s9, 8192 }
   0xe   : > { %p2263_p8 = pnand %p1793_p7, %p2513_p1  ;;  %p2065_p10 = scmp.ne.s32.totalorder %s221_s9, %s2064_s14 }
   0xf   : > { %p2072_p13 = scmp.lt.s32.totalorder %s221_s9, %s221_s9  ;;  %p2073_p0 = scmp.lt.s32.totalorder %s2064_s14, %s2064_s14 }
  0x10   : > { %p2055_p9 = pneg %p2263_p8 }
  0x11   : > { %p2074_p2 = por %p2073_p0, %p2072_p13 }
  0x12   : > { %p2067_p11 = pnand %p2065_p10, %p2055_p9 }
  0x14   : > { %p2068_p12 = pneg %p2067_p11 }
  0x16   : > { %p2075_p3 = pnand %p2074_p2, %p2068_p12 }
  0x18   : > { %2078 = shalt.err (!%p2075_p3)
}
  0x19   : > { %s2176_s15 = smov 128   ;;  %s2177_s16 = smov 8  }
  0x1a   : > { %1796 = dma.hbm_to_vmem [thread:$0]  (!%p2263_p8), %s2508_s3, 8192, %s221_s9, [#allocation7], %s2176_s15, %s2176_s15, %s2177_s16  }
  0x1b   : > { %p53_p7 = scmp.eq.s32.totalorder %s52_s13, 0  ;;  %p62_p9 = scmp.ne.s32.totalorder %s2169_s26, %s2165_s25 }
  0x1c   : > { %p63_p10 = scmp.eq.s32.totalorder %s2173_s27, 0  ;;  %p1802_p11 = scmp.lt.s32.totalorder %s2173_s27, 4 }
  0x1d   : > { %s2285_s19 = scalar_select %p53_p7, %s2169_s26, %s55_s12  }
  0x1e   : > { %p64_p12 = por %p63_p10, %p62_p9  ;;  %s252_s20 = sand.u32 1, %s2169_s26  }
  0x1f   : > { %s1599_s21 = sshll.u32 %s252_s20, 9  ;;  %s1760_s22 = sshll.u32 %s2173_s27, 13 }
  0x20   : > { %s2292_s8 = scalar_lea.hbm %s2506_s1, %s1760_s22  ;;  %s256_s10 = scalar_lea.vmem [#allocation3], %s1599_s21 }
  0x21   : > { %s264_s9 = sshll.u32 %s256_s10, 4  ;;  %p2296_p8 = pnand %p1802_p11, %p64_p12  ;;  %s2294_s9 = int_to_ptr.vmem [resolvable:$true] %s264_s9 }
  0x22   : > { %s2300_s12 = scalar_lea.sflag [#allocation4], %s252_s20  ;;  %s2079_s27 = scalar_lea.hbm %s2292_s8, 8192 }
  0x23   : > { %p2080_p13 = scmp.ne.s32.totalorder %s2292_s8, %s2079_s27  ;;  %p2081_p0 = pneg %p2296_p8 }
  0x24   : > { %s2084_s16 = scalar_lea.hbm %s2506_s1, 32768  ;;  %p2085_p7 = scmp.lt.s32.totalorder %s2292_s8, %s2506_s1 }
  0x25   : > { %p2082_p2 = pnand %p2081_p0, %p2080_p13  ;;  %p2086_p9 = scmp.lt.s32.totalorder %s2084_s16, %s2079_s27 }
  0x27   : > { %p2083_p3 = pneg %p2082_p2  ;;  %p2087_p10 = por %p2086_p9, %p2085_p7 }
  0x29   : > { %p2088_p11 = pnand %p2087_p10, %p2083_p3 }
  0x2b   : > { %2091 = shalt.err (!%p2088_p11)
}
  0x2c   : > { %s2092_s20 = scalar_lea.vmem %s2294_s9, 8192  ;;  %s2178_s21 = smov [#allocation3]  }
  0x2d   : > { %p2093_p12 = scmp.ne.s32.totalorder %s2294_s9, %s2092_s20  ;;  %s2097_s22 = sshll.u32 %s2178_s21, 4  ;;  %s2098_s22 = int_to_ptr.vmem [resolvable:$false] %s2097_s22 }
  0x2e   : > { %s2099_s23 = scalar_lea.vmem %s2098_s22, 16384  ;;  %p2100_p2 = scmp.lt.s32.totalorder %s2294_s9, %s2098_s22 }
  0x2f   : > { %p2095_p4 = pnand %p2093_p12, %p2081_p0  ;;  %p2101_p1 = scmp.lt.s32.totalorder %s2099_s23, %s2092_s20 }
  0x31   : > { %p2096_p13 = pneg %p2095_p4  ;;  %p2102_p5 = por %p2101_p1, %p2100_p2 }
  0x33   : > { %p2103_p6 = pnand %p2102_p5, %p2096_p13 }
  0x35   : > { %2106 = shalt.err (!%p2103_p6)
}
  0x36   : > { %s2179_s24 = smov 256   ;;  %s2180_s10 = smov 16  }
  0x37   : > { %1800 = dma.hbm_to_vmem [thread:$0]  (!%p2296_p8), %s2292_s8, 8192, %s2294_s9, %s2300_s12, %s2179_s24, %s2179_s24, %s2180_s10  }
  0x38   : > { %p2520_p0 = scmp.ne.s32.totalorder %s2517_s30, 0 }
  0x39   : > { %s278_s27 = sand.u32 (!%p2520_p0), 1, %s2165_s25   ;;  %p2521_p1 = scmp.ne.s32.totalorder (!%p2520_p0), %s2516_s29, 0 }
  0x3a   : > { %276 = sbr.rel (%p2520_p0) target bundleno = 825 (0x339), region = 48  ;;  %s1604_s14 = sshll.u32 (!%p2520_p0), %s278_s27, 9 }
  0x3b   : > { %s279_s15 = scalar_lea.sflag (!%p2520_p0), [#allocation4], %s278_s27  ;;  %s2324_s16 = scalar_lea.vmem (!%p2520_p0), [#allocation3], %s1604_s14 }
  0x3f   : > { %2148 = dma.done.wait (%p2521_p1), %s279_s15, 8192  }
  0x40   : > { %2150 = vsyncadd (%p2521_p1), %s279_s15, 4294959104  ;;  %p2522_p4 = scmp.eq.s32.totalorder %s2242_s28, 0 }
  0x42   : > { %2152 = dma.done.wait (%p2522_p4), [#allocation7], 8192   ;;  %p2523_p5 = pmov %p2522_p4 }
  0x43   : > { %s1606_s30 = sshll.u32 %s2242_s28, 1  ;;  %p2524_p8 = scmp.ne.s32.totalorder %s2242_s28, 0 }
  0x44   : > { %2154 = vsyncadd (%p2523_p5), [#allocation7], 4294959104  ;;  %p318_p6 = scmp.lt.s32.totalorder %s1606_s30, 7 }
  0x45   : > { %328 = sbr.rel (%p2524_p8) target bundleno = 77 (0x4d), region = 60 }
  0x46   : > { %s2530_s30 = smov (!%p318_p6, %s1606_s30), 7 }
  0x47   : > { %s1607_s8 = sshll.u32 %s2530_s30, 3 }
  0x48   : > { %s2338_s12 = scalar_lea.vmem %s2505_s0, %s1607_s8 }
  0x4a   : > { %v2181_v0 = vmov 0.0  }
  0x4b   : > { %329 = vst [vmem:[#allocation2 + $0x10] sm:$0xff] %v2181_v0  ;;  %330 = vst [vmem:[#allocation2] sm:$0xff] %v2181_v0 }
  0x4c   : > { %331 = vst [vmem:[#allocation2 + $0x18] sm:$0xff] %v2181_v0  ;;  %332 = vst [vmem:[#allocation2 + $0x8] sm:$0xff] %v2181_v0 }
  0x4d PF: > { %v1845_v1 = vld [vmem:[%s2324_s16 + $0xe4] ss:$16 sps:$4 sm:$0xff]   ;;  %v1847_v2 = vld [vmem:[%s2324_s16 + $0xec] ss:$16 sps:$4 sm:$0xff]   ;;  %v1849_v3 = vld [vmem:[%s2324_s16 + $0xe0] ss:$16 sps:$4 sm:$0xff]  }
  0x4e   : > { %725 = vmatprep.subr.bf16.mxu0 %v1845_v1  ;;  %v1850_v4 = vld [vmem:[%s2324_s16 + $0xe8] ss:$16 sps:$4 sm:$0xff]   ;;  %766 = vmatprep.subr.bf16.mxu1 %v1847_v2  ;;  %v1851_v5 = vld [vmem:[%s2324_s16 + $0xc4] ss:$16 sps:$4 sm:$0xff]   ;;  %v1853_v6 = vld [vmem:[%s2324_s16 + $0xcc] ss:$16 sps:$4 sm:$0xff]  }
  0x4f   : > { %726 = vmatpush1.bf16.msra.mxu0 %v1849_v3  ;;  %767 = vmatpush1.bf16.msra.mxu1 %v1850_v4  ;;  %v1855_v7 = vld [vmem:[%s2324_s16 + $0xc0] ss:$16 sps:$4 sm:$0xff]   ;;  %v1856_v8 = vld [vmem:[%s2324_s16 + $0xc8] ss:$16 sps:$4 sm:$0xff]   ;;  %v1857_v9 = vld [vmem:[%s2324_s16 + $0xa4] ss:$16 sps:$4 sm:$0xff]  }
  0x50   : > { %727 = vmatprep.subr.bf16.mxu0 %v1851_v5  ;;  %768 = vmatprep.subr.bf16.mxu1 %v1853_v6  ;;  %v1859_v10 = vld [vmem:[%s2324_s16 + $0xac] ss:$16 sps:$4 sm:$0xff]   ;;  %v1861_v11 = vld [vmem:[%s2324_s16 + $0xa0] ss:$16 sps:$4 sm:$0xff]   ;;  %v1862_v12 = vld [vmem:[%s2324_s16 + $0xa8] ss:$16 sps:$4 sm:$0xff]  }
  0x51   : > { %v1863_v13 = vld [vmem:[%s2324_s16 + $0x84] ss:$16 sps:$4 sm:$0xff]   ;;  %v1865_v14 = vld [vmem:[%s2324_s16 + $0x8c] ss:$16 sps:$4 sm:$0xff]   ;;  %v1867_v15 = vld [vmem:[%s2324_s16 + $0x80] ss:$16 sps:$4 sm:$0xff]  }
  0x52   : > { %v1868_v16 = vld [vmem:[%s2324_s16 + $0x88] ss:$16 sps:$4 sm:$0xff]   ;;  %v1869_v17 = vld [vmem:[%s2324_s16 + $0x64] ss:$16 sps:$4 sm:$0xff]   ;;  %v1871_v18 = vld [vmem:[%s2324_s16 + $0x6c] ss:$16 sps:$4 sm:$0xff]  }
  0x53   : > { %728 = vmatpush1.bf16.msra.mxu0 %v1855_v7  ;;  %769 = vmatpush1.bf16.msra.mxu1 %v1856_v8  ;;  %v1873_v19 = vld [vmem:[%s2324_s16 + $0x60] ss:$16 sps:$4 sm:$0xff]   ;;  %v1874_v20 = vld [vmem:[%s2324_s16 + $0x68] ss:$16 sps:$4 sm:$0xff]   ;;  %v1875_v21 = vld [vmem:[%s2324_s16 + $0x44] ss:$16 sps:$4 sm:$0xff]  }
  0x54   : > { %729 = vmatprep.subr.bf16.mxu0 %v1857_v9  ;;  %770 = vmatprep.subr.bf16.mxu1 %v1859_v10  ;;  %v1877_v22 = vld [vmem:[%s2324_s16 + $0x4c] ss:$16 sps:$4 sm:$0xff]   ;;  %v1879_v23 = vld [vmem:[%s2324_s16 + $0x40] ss:$16 sps:$4 sm:$0xff]   ;;  %v1880_v24 = vld [vmem:[%s2324_s16 + $0x48] ss:$16 sps:$4 sm:$0xff]  }
  0x55   : > { %v1881_v25 = vld [vmem:[%s2324_s16 + $0x24] ss:$16 sps:$4 sm:$0xff]   ;;  %v1883_v26 = vld [vmem:[%s2324_s16 + $0x2c] ss:$16 sps:$4 sm:$0xff]   ;;  %v1885_v27 = vld [vmem:[%s2324_s16 + $0x20] ss:$16 sps:$4 sm:$0xff]  }
  0x56   : > { %v1886_v28 = vld [vmem:[%s2324_s16 + $0x28] ss:$16 sps:$4 sm:$0xff]   ;;  %v1887_v29 = vld [vmem:[%s2324_s16 + $0x4] ss:$16 sps:$4 sm:$0xff]   ;;  %v1889_v30 = vld [vmem:[%s2324_s16 + $0xc] ss:$16 sps:$4 sm:$0xff]  }
  0x57   : > { %730 = vmatpush1.bf16.msra.mxu0 %v1861_v11  ;;  %771 = vmatpush1.bf16.msra.mxu1 %v1862_v12  ;;  %v1891_v31 = vld [vmem:[%s2324_s16] ss:$16 sps:$4 sm:$0xff]   ;;  %v1892_v32 = vld [vmem:[%s2324_s16 + $0x8] ss:$16 sps:$4 sm:$0xff]   ;;  %v1893_v33 = vld [vmem:[%s2324_s16 + $0x1e4] ss:$16 sps:$4 sm:$0xff]  }
  0x58   : > { %731 = vmatprep.subr.bf16.mxu0 %v1863_v13  ;;  %772 = vmatprep.subr.bf16.mxu1 %v1865_v14  ;;  %v1895_v34 = vld [vmem:[%s2324_s16 + $0x1ec] ss:$16 sps:$4 sm:$0xff]   ;;  %v1897_v35 = vld [vmem:[%s2324_s16 + $0x1e0] ss:$16 sps:$4 sm:$0xff]   ;;  %v1898_v36 = vld [vmem:[%s2324_s16 + $0x1e8] ss:$16 sps:$4 sm:$0xff]  }
  0x59   : > { %v1899_v37 = vld [vmem:[%s2324_s16 + $0x1c4] ss:$16 sps:$4 sm:$0xff]   ;;  %v1901_v38 = vld [vmem:[%s2324_s16 + $0x1cc] ss:$16 sps:$4 sm:$0xff]   ;;  %v1903_v39 = vld [vmem:[%s2324_s16 + $0x1c0] ss:$16 sps:$4 sm:$0xff]  }
  0x5a   : > { %v1904_v40 = vld [vmem:[%s2324_s16 + $0x1c8] ss:$16 sps:$4 sm:$0xff]   ;;  %v1905_v41 = vld [vmem:[%s2324_s16 + $0x1a4] ss:$16 sps:$4 sm:$0xff]   ;;  %v1907_v42 = vld [vmem:[%s2324_s16 + $0x1ac] ss:$16 sps:$4 sm:$0xff]  }
  0x5b   : > { %732 = vmatpush1.bf16.msra.mxu0 %v1867_v15  ;;  %773 = vmatpush1.bf16.msra.mxu1 %v1868_v16  ;;  %v1909_v43 = vld [vmem:[%s2324_s16 + $0x1a0] ss:$16 sps:$4 sm:$0xff]   ;;  %v1910_v44 = vld [vmem:[%s2324_s16 + $0x1a8] ss:$16 sps:$4 sm:$0xff]   ;;  %v1911_v45 = vld [vmem:[%s2324_s16 + $0x184] ss:$16 sps:$4 sm:$0xff]  }
  0x5c   : > { %733 = vmatprep.subr.bf16.mxu0 %v1869_v17  ;;  %774 = vmatprep.subr.bf16.mxu1 %v1871_v18  ;;  %v1913_v46 = vld [vmem:[%s2324_s16 + $0x18c] ss:$16 sps:$4 sm:$0xff]   ;;  %v1915_v49 = vld [vmem:[%s2324_s16 + $0x180] ss:$16 sps:$4 sm:$0xff]   ;;  %v1916_v50 = vld [vmem:[%s2324_s16 + $0x188] ss:$16 sps:$4 sm:$0xff]  }
  0x5d   : > { %v334_v47 = vld [vmem:[%s2338_s12 + $0x8] sm:$0xff]  ;;  %v1917_v51 = vld [vmem:[%s2324_s16 + $0x164] ss:$16 sps:$4 sm:$0xff]   ;;  %v1921_v53 = vld [vmem:[%s2324_s16 + $0x160] ss:$16 sps:$4 sm:$0xff]   ;;  %p1673_p3 = scmp.ne.s32.totalorder %s2242_s28, 3 }
  0x5e   : > { %v336_v48 = vpack.c.bf16 %v334_v47, %v334_v47  ;;  %v1919_v52 = vld [vmem:[%s2324_s16 + $0x16c] ss:$16 sps:$4 sm:$0xff]   ;;  %v1922_v54 = vld [vmem:[%s2324_s16 + $0x168] ss:$16 sps:$4 sm:$0xff]   ;;  %v1923_v55 = vld [vmem:[%s2324_s16 + $0x144] ss:$16 sps:$4 sm:$0xff]  }
  0x5f   : > { %734 = vmatpush1.bf16.msra.mxu0 %v1873_v19  ;;  %775 = vmatpush1.bf16.msra.mxu1 %v1874_v20  ;;  %v1925_v56 = vld [vmem:[%s2324_s16 + $0x14c] ss:$16 sps:$4 sm:$0xff]   ;;  %v1927_v57 = vld [vmem:[%s2324_s16 + $0x140] ss:$16 sps:$4 sm:$0xff]   ;;  %v1928_v58 = vld [vmem:[%s2324_s16 + $0x148] ss:$16 sps:$4 sm:$0xff]  }
  0x60   : > { %735 = vmatprep.subr.bf16.mxu0 %v1875_v21  ;;  %776 = vmatprep.subr.bf16.mxu1 %v1877_v22  ;;  %v1929_v59 = vld [vmem:[%s2324_s16 + $0x124] ss:$16 sps:$4 sm:$0xff]   ;;  %v1931_v60 = vld [vmem:[%s2324_s16 + $0x12c] ss:$16 sps:$4 sm:$0xff]   ;;  %v1933_v61 = vld [vmem:[%s2324_s16 + $0x120] ss:$16 sps:$4 sm:$0xff]  }
  0x61   : > { %757 = vmatprep.mubr.bf16.mxu0 %v336_v48  ;;  %798 = vmatprep.mubr.bf16.mxu1 %v336_v48  ;;  %v1934_v62 = vld [vmem:[%s2324_s16 + $0x128] ss:$16 sps:$4 sm:$0xff]   ;;  %v1935_v63 = vld [vmem:[%s2324_s16 + $0x104] ss:$16 sps:$4 sm:$0xff]   ;;  %v1937_v0 = vld [vmem:[%s2324_s16 + $0x10c] ss:$16 sps:$4 sm:$0xff]  }
  0x62   : > { %v1939_v1 = vld [vmem:[%s2324_s16 + $0x100] ss:$16 sps:$4 sm:$0xff]   ;;  %v1940_v2 = vld [vmem:[%s2324_s16 + $0x108] ss:$16 sps:$4 sm:$0xff]  }
  0x63   : > { %736 = vmatpush1.bf16.msra.mxu0 %v1879_v23  ;;  %777 = vmatpush1.bf16.msra.mxu1 %v1880_v24  ;;  %v333_v3 = vld [vmem:[%s2338_s12] sm:$0xff]  ;;  %v337_v5 = vld [vmem:[#allocation2 + $0x10] sm:$0xff]  ;;  %v339_v6 = vld [vmem:[#allocation2 + $0x18] sm:$0xff] }
  0x64   : > { %737 = vmatprep.subr.bf16.mxu0 %v1881_v25  ;;  %778 = vmatprep.subr.bf16.mxu1 %v1883_v26  ;;  %v335_v4 = vpack.c.bf16 %v333_v3, %v333_v3  ;;  %v338_v9 = vld [vmem:[#allocation2] sm:$0xff]  ;;  %v340_v10 = vld [vmem:[#allocation2 + $0x8] sm:$0xff] }
  0x67   : > { %738 = vmatpush1.bf16.msra.mxu0 %v1885_v27  ;;  %779 = vmatpush1.bf16.msra.mxu1 %v1886_v28 }
  0x68   : > { %739 = vmatprep.subr.bf16.mxu0 %v1887_v29  ;;  %780 = vmatprep.subr.bf16.mxu1 %v1889_v30 }
  0x6b   : > { %740 = vmatpush1.bf16.msra.mxu0 %v1891_v31  ;;  %781 = vmatpush1.bf16.msra.mxu1 %v1892_v32 }
  0x6c   : > { %741 = vmatprep.subr.bf16.mxu0 %v1893_v33  ;;  %782 = vmatprep.subr.bf16.mxu1 %v1895_v34 }
  0x6f   : > { %742 = vmatpush2.bf16.msra.mxu0 %v1897_v35  ;;  %783 = vmatpush2.bf16.msra.mxu1 %v1898_v36 }
  0x70   : > { %743 = vmatprep.subr.bf16.mxu0 %v1899_v37  ;;  %784 = vmatprep.subr.bf16.mxu1 %v1901_v38 }
  0x73   : > { %744 = vmatpush2.bf16.msra.mxu0 %v1903_v39  ;;  %785 = vmatpush2.bf16.msra.mxu1 %v1904_v40 }
  0x74   : > { %745 = vmatprep.subr.bf16.mxu0 %v1905_v41  ;;  %786 = vmatprep.subr.bf16.mxu1 %v1907_v42 }
  0x77   : > { %746 = vmatpush2.bf16.msra.mxu0 %v1909_v43  ;;  %787 = vmatpush2.bf16.msra.mxu1 %v1910_v44 }
  0x78   : > { %747 = vmatprep.subr.bf16.mxu0 %v1911_v45  ;;  %788 = vmatprep.subr.bf16.mxu1 %v1913_v46 }
  0x7b   : > { %748 = vmatpush2.bf16.msra.mxu0 %v1915_v49  ;;  %789 = vmatpush2.bf16.msra.mxu1 %v1916_v50 }
  0x7c   : > { %749 = vmatprep.subr.bf16.mxu0 %v1917_v51  ;;  %790 = vmatprep.subr.bf16.mxu1 %v1919_v52 }
  0x7f   : > { %750 = vmatpush2.bf16.msra.mxu0 %v1921_v53  ;;  %791 = vmatpush2.bf16.msra.mxu1 %v1922_v54 }
  0x80   : > { %751 = vmatprep.subr.bf16.mxu0 %v1923_v55  ;;  %792 = vmatprep.subr.bf16.mxu1 %v1925_v56 }
  0x83   : > { %752 = vmatpush2.bf16.msra.mxu0 %v1927_v57  ;;  %793 = vmatpush2.bf16.msra.mxu1 %v1928_v58 }
  0x84   : > { %753 = vmatprep.subr.bf16.mxu0 %v1929_v59  ;;  %794 = vmatprep.subr.bf16.mxu1 %v1931_v60 }
  0x87   : > { %754 = vmatpush2.bf16.msra.mxu0 %v1933_v61  ;;  %795 = vmatpush2.bf16.msra.mxu1 %v1934_v62 }
  0x88   : > { %755 = vmatprep.subr.bf16.mxu0 %v1935_v63  ;;  %796 = vmatprep.subr.bf16.mxu1 %v1937_v0 }
  0x8b   : > { %756 = vmatpush2.bf16.msra.mxu0 %v1939_v1  ;;  %797 = vmatpush2.bf16.msra.mxu1 %v1940_v2 }
  0x8e   : > { %758 = vmatmul.mubr.bf16.vlgmr.msra.gmra.mxu0 %v335_v4  ;;  %799 = vmatmul.mubr.bf16.vlgmr.msra.gmra.mxu1 %v335_v4 }
 0x14e   : > { %v759_v7 = vpop.f32.mrf.mxu0  ;;  %v800_v8 = vpop.f32.mrf.mxu1 }
 0x14f   : > { %v807_v11 = vadd.f32 %v759_v7, %v337_v5  ;;  %v809_v12 = vadd.f32 %v800_v8, %v339_v6 }
 0x150   : > { %v761_v13 = vpop.f32.mrf.mxu0  ;;  %v802_v14 = vpop.f32.mrf.mxu1  ;;  %818 = sbr.rel (%p1673_p3) target bundleno = 810 (0x32a), region = 64 }
 0x151   : > { %811 = vst [vmem:[#allocation2 + $0x10] sm:$0xff] %v807_v11  ;;  %813 = vst [vmem:[#allocation2 + $0x18] sm:$0xff] %v809_v12  ;;  %v808_v15 = vadd.f32 %v761_v13, %v338_v9  ;;  %v810_v16 = vadd.f32 %v802_v14, %v340_v10 }
 0x152   : > { %v763_v17 = vpop.f32.mrf.mxu0  ;;  %v804_v18 = vpop.f32.mrf.mxu1 }
 0x153   : > { %812 = vst [vmem:[#allocation2] sm:$0xff] %v808_v15  ;;  %814 = vst [vmem:[#allocation2 + $0x8] sm:$0xff] %v810_v16 }
 0x154   : > { %v764_v19 = vpop.f32.mrf.mxu0  ;;  %v805_v20 = vpop.f32.mrf.mxu1 }
 0x155   : > { %v1941_v21 = vld [vmem:[#allocation6 + $0x74] ss:$8 sps:$4 sm:$0xff]   ;;  %v1945_v23 = vld [vmem:[#allocation6 + $0x70] ss:$8 sps:$4 sm:$0xff]   ;;  %v1947_v25 = vld [vmem:[#allocation6 + $0x64] ss:$8 sps:$4 sm:$0xff]   ;;  %v825_v58 = vlaneseq }
 0x156   : > { %v1943_v22 = vld [vmem:[#allocation6 + $0x174] ss:$8 sps:$4 sm:$0xff]   ;;  %1253 = vmatprep.subr.bf16.mxu0 %v1941_v21  ;;  %v1946_v24 = vld [vmem:[#allocation6 + $0x170] ss:$8 sps:$4 sm:$0xff]   ;;  %v1949_v26 = vld [vmem:[#allocation6 + $0x164] ss:$8 sps:$4 sm:$0xff]  }
 0x157   : > { %1294 = vmatprep.subr.bf16.mxu1 %v1943_v22  ;;  %1254 = vmatpush1.bf16.msra.mxu0 %v1945_v23  ;;  %v1951_v27 = vld [vmem:[#allocation6 + $0x60] ss:$8 sps:$4 sm:$0xff]   ;;  %v1953_v29 = vld [vmem:[#allocation6 + $0x54] ss:$8 sps:$4 sm:$0xff]   ;;  %v1957_v31 = vld [vmem:[#allocation6 + $0x50] ss:$8 sps:$4 sm:$0xff]  }
 0x158   : > { %1295 = vmatpush1.bf16.msra.mxu1 %v1946_v24  ;;  %1255 = vmatprep.subr.bf16.mxu0 %v1947_v25  ;;  %v1952_v28 = vld [vmem:[#allocation6 + $0x160] ss:$8 sps:$4 sm:$0xff]   ;;  %v1955_v30 = vld [vmem:[#allocation6 + $0x154] ss:$8 sps:$4 sm:$0xff]   ;;  %v1958_v32 = vld [vmem:[#allocation6 + $0x150] ss:$8 sps:$4 sm:$0xff]  }
 0x159   : > { %1296 = vmatprep.subr.bf16.mxu1 %v1949_v26  ;;  %v1959_v33 = vld [vmem:[#allocation6 + $0x44] ss:$8 sps:$4 sm:$0xff]   ;;  %v1963_v35 = vld [vmem:[#allocation6 + $0x40] ss:$8 sps:$4 sm:$0xff]   ;;  %v1965_v37 = vld [vmem:[#allocation6 + $0x34] ss:$8 sps:$4 sm:$0xff]  }
 0x15a   : > { %v1961_v34 = vld [vmem:[#allocation6 + $0x144] ss:$8 sps:$4 sm:$0xff]   ;;  %v1964_v36 = vld [vmem:[#allocation6 + $0x140] ss:$8 sps:$4 sm:$0xff]   ;;  %v1967_v38 = vld [vmem:[#allocation6 + $0x134] ss:$8 sps:$4 sm:$0xff]  }
 0x15b   : > { %1256 = vmatpush1.bf16.msra.mxu0 %v1951_v27  ;;  %v1969_v39 = vld [vmem:[#allocation6 + $0x30] ss:$8 sps:$4 sm:$0xff]   ;;  %v1971_v41 = vld [vmem:[#allocation6 + $0x24] ss:$8 sps:$4 sm:$0xff]   ;;  %v1975_v43 = vld [vmem:[#allocation6 + $0x20] ss:$8 sps:$4 sm:$0xff]  }
 0x15c   : > { %1297 = vmatpush1.bf16.msra.mxu1 %v1952_v28  ;;  %1257 = vmatprep.subr.bf16.mxu0 %v1953_v29  ;;  %v1970_v40 = vld [vmem:[#allocation6 + $0x130] ss:$8 sps:$4 sm:$0xff]   ;;  %v1973_v42 = vld [vmem:[#allocation6 + $0x124] ss:$8 sps:$4 sm:$0xff]   ;;  %v1976_v44 = vld [vmem:[#allocation6 + $0x120] ss:$8 sps:$4 sm:$0xff]  }
 0x15d   : > { %1298 = vmatprep.subr.bf16.mxu1 %v1955_v30  ;;  %v1977_v45 = vld [vmem:[#allocation6 + $0x14] ss:$8 sps:$4 sm:$0xff]   ;;  %v1981_v47 = vld [vmem:[#allocation6 + $0x10] ss:$8 sps:$4 sm:$0xff]   ;;  %v1983_v49 = vld [vmem:[#allocation6 + $0x4] ss:$8 sps:$4 sm:$0xff]  }
 0x15e   : > { %v1979_v46 = vld [vmem:[#allocation6 + $0x114] ss:$8 sps:$4 sm:$0xff]   ;;  %v1982_v48 = vld [vmem:[#allocation6 + $0x110] ss:$8 sps:$4 sm:$0xff]   ;;  %v1985_v50 = vld [vmem:[#allocation6 + $0x104] ss:$8 sps:$4 sm:$0xff]  }
 0x15f   : > { %1258 = vmatpush1.bf16.msra.mxu0 %v1957_v31  ;;  %v1987_v51 = vld [vmem:[#allocation6] ss:$8 sps:$4 sm:$0xff]   ;;  %v1989_v53 = vld [vmem:[#allocation6 + $0xf4] ss:$8 sps:$4 sm:$0xff]   ;;  %v1993_v55 = vld [vmem:[#allocation6 + $0xf0] ss:$8 sps:$4 sm:$0xff]  }
 0x160   : > { %1299 = vmatpush1.bf16.msra.mxu1 %v1958_v32  ;;  %1259 = vmatprep.subr.bf16.mxu0 %v1959_v33  ;;  %v1988_v52 = vld [vmem:[#allocation6 + $0x100] ss:$8 sps:$4 sm:$0xff]   ;;  %v1991_v54 = vld [vmem:[#allocation6 + $0x1f4] ss:$8 sps:$4 sm:$0xff]   ;;  %v1994_v56 = vld [vmem:[#allocation6 + $0x1f0] ss:$8 sps:$4 sm:$0xff]  }
 0x161   : > { %1300 = vmatprep.subr.bf16.mxu1 %v1961_v34  ;;  %v1995_v57 = vld [vmem:[#allocation6 + $0xe4] ss:$8 sps:$4 sm:$0xff]   ;;  %v1999_v60 = vld [vmem:[#allocation6 + $0xe0] ss:$8 sps:$4 sm:$0xff]   ;;  %v2001_v62 = vld [vmem:[#allocation6 + $0xd4] ss:$8 sps:$4 sm:$0xff]  }
 0x162   : > { %v1997_v59 = vld [vmem:[#allocation6 + $0x1e4] ss:$8 sps:$4 sm:$0xff]   ;;  %v2000_v61 = vld [vmem:[#allocation6 + $0x1e0] ss:$8 sps:$4 sm:$0xff]   ;;  %v2409_v63 = vshrl.u32 %v825_v58, 7  ;;  %v819_v31 = vld [vmem:[#allocation2 + $0x10] sm:$0xff] }
 0x163   : > { %1260 = vmatpush1.bf16.msra.mxu0 %v1963_v35  ;;  %v2003_v0 = vld [vmem:[#allocation6 + $0x1d4] ss:$8 sps:$4 sm:$0xff]   ;;  %v2005_v1 = vld [vmem:[#allocation6 + $0xd0] ss:$8 sps:$4 sm:$0xff]   ;;  %v2007_v3 = vld [vmem:[#allocation6 + $0xc4] ss:$8 sps:$4 sm:$0xff]  }
 0x164   : > { %1301 = vmatpush1.bf16.msra.mxu1 %v1964_v36  ;;  %1261 = vmatprep.subr.bf16.mxu0 %v1965_v37  ;;  %v2006_v2 = vld [vmem:[#allocation6 + $0x1d0] ss:$8 sps:$4 sm:$0xff]   ;;  %v831_v4 = vsub.s32 1, %v2409_v63  ;;  %v839_v5 = vsub.s32 3, %v2409_v63  ;;  %v2009_v6 = vld [vmem:[#allocation6 + $0x1c4] ss:$8 sps:$4 sm:$0xff]  }
 0x165   : > { %1302 = vmatprep.subr.bf16.mxu1 %v1967_v38  ;;  %v2011_v7 = vld [vmem:[#allocation6 + $0xc0] ss:$8 sps:$4 sm:$0xff]   ;;  %v827_v12 = vsub.s32 0, %v2409_v63  ;;  %v835_v13 = vsub.s32 2, %v2409_v63  ;;  %v2013_v14 = vld [vmem:[#allocation6 + $0xb4] ss:$8 sps:$4 sm:$0xff]  }
 0x166   : > { %v2012_v8 = vld [vmem:[#allocation6 + $0x1c0] ss:$8 sps:$4 sm:$0xff]   ;;  %v2015_v17 = vld [vmem:[#allocation6 + $0x1b4] ss:$8 sps:$4 sm:$0xff]   ;;  %v2017_v18 = vld [vmem:[#allocation6 + $0xb0] ss:$8 sps:$4 sm:$0xff]  }
 0x167   : > { %1262 = vmatpush1.bf16.msra.mxu0 %v1969_v39  ;;  %v820_v9 = vld [vmem:[#allocation2] sm:$0xff]  ;;  %v822_v11 = vld [vmem:[#allocation2 + $0x8] sm:$0xff]  ;;  %v2018_v21 = vld [vmem:[#allocation6 + $0x1b0] ss:$8 sps:$4 sm:$0xff]   ;;  %vm1514_vm0 = vcmask 130048  }
 0x168   : > { %1303 = vmatpush1.bf16.msra.mxu1 %v1970_v40  ;;  %1263 = vmatprep.subr.bf16.mxu0 %v1971_v41  ;;  %v823_v10 = vld [vmem:[%s2507_s2] sm:$0xf]  ;;  %v2019_v22 = vld [vmem:[#allocation6 + $0xa4] ss:$8 sps:$4 sm:$0xff]   ;;  %v2025_v30 = vld [vmem:[#allocation6 + $0x94] ss:$8 sps:$4 sm:$0xff]  }
 0x169   : > { %1304 = vmatprep.subr.bf16.mxu1 %v1973_v42  ;;  %v832_v15 = vrot.slane %v823_v10, %v831_v4  ;;  %v840_v16 = vrot.slane %v823_v10, %v839_v5  ;;  %v2021_v25 = vld [vmem:[#allocation6 + $0x1a4] ss:$8 sps:$4 sm:$0xff]   ;;  %v2023_v26 = vld [vmem:[#allocation6 + $0xa0] ss:$8 sps:$4 sm:$0xff]   ;;  %v828_v32 = vrot.slane %v823_v10, %v827_v12  ;;  %v836_v33 = vrot.slane %v823_v10, %v835_v13  ;;  %v821_v34 = vld [vmem:[#allocation2 + $0x18] sm:$0xff] }
 0x16a   : > { %v2024_v27 = vld [vmem:[#allocation6 + $0x1a0] ss:$8 sps:$4 sm:$0xff]   ;;  %v2027_v35 = vld [vmem:[#allocation6 + $0x194] ss:$8 sps:$4 sm:$0xff]   ;;  %v2029_v36 = vld [vmem:[#allocation6 + $0x90] ss:$8 sps:$4 sm:$0xff]  }
 0x16b   : > { %1264 = vmatpush1.bf16.msra.mxu0 %v1975_v43  ;;  %v846_v19 = vadd.f32 %v832_v15, %v820_v9  ;;  %v848_v20 = vadd.f32 %v840_v16, %v822_v11  ;;  %v2030_v37 = vld [vmem:[#allocation6 + $0x190] ss:$8 sps:$4 sm:$0xff]   ;;  %v2031_v38 = vld [vmem:[#allocation6 + $0x84] ss:$8 sps:$4 sm:$0xff]   ;;  %v845_v40 = vadd.f32 %v828_v32, %v819_v31  ;;  %v847_v41 = vadd.f32 %v836_v33, %v821_v34 }
 0x16c   : > { %1305 = vmatpush1.bf16.msra.mxu1 %v1976_v44  ;;  %1265 = vmatprep.subr.bf16.mxu0 %v1977_v45  ;;  %v2033_v39 = vld [vmem:[#allocation6 + $0x184] ss:$8 sps:$4 sm:$0xff]   ;;  %v2035_v44 = vld [vmem:[#allocation6 + $0x80] ss:$8 sps:$4 sm:$0xff]   ;;  %v2047_v58 = vld [vmem:[%s2510_s5 + $0x50] sm:$0xff]  }
 0x16d   : > { %1306 = vmatprep.subr.bf16.mxu1 %v1979_v46  ;;  %v850_v23 = vmax.f32 %v846_v19, 0.0  ;;  %v852_v24 = vmax.f32 %v848_v20, 0.0  ;;  %v849_v42 = vmax.f32 %v845_v40, 0.0  ;;  %v851_v43 = vmax.f32 %v847_v41, 0.0  ;;  %v2036_v45 = vld [vmem:[#allocation6 + $0x180] ss:$8 sps:$4 sm:$0xff]  }
 0x16e   : > { %v2037_v46 = vld [vmem:[%s2510_s5 + $0x78] sm:$0xff]  }
 0x16f   : > { %1266 = vmatpush1.bf16.msra.mxu0 %v1981_v47  ;;  %v854_v28 = vpack.c.bf16 %v850_v23, %v850_v23  ;;  %v856_v29 = vpack.c.bf16 %v852_v24, %v852_v24  ;;  %v853_v47 = vpack.c.bf16 %v849_v42, %v849_v42 }
 0x170   : > { %1307 = vmatpush1.bf16.msra.mxu1 %v1982_v48  ;;  %1267 = vmatprep.subr.bf16.mxu0 %v1983_v49  ;;  %v855_v48 = vpack.c.bf16 %v851_v43, %v851_v43  ;;  %v2038_v49 = vld [vmem:[%s2510_s5 + $0x38] sm:$0xff]  }
 0x171   : > { %1308 = vmatprep.subr.bf16.mxu1 %v1985_v50  ;;  %1285 = vmatprep.mubr.bf16.mxu0 %v854_v28  ;;  %v2039_v50 = vld [vmem:[%s2510_s5 + $0x70] sm:$0xff]  }
 0x172   : > { %1326 = vmatprep.mubr.bf16.mxu1 %v856_v29 }
 0x173   : > { %1268 = vmatpush1.bf16.msra.mxu0 %v1987_v51  ;;  %v2040_v51 = vld [vmem:[%s2510_s5 + $0x30] sm:$0xff]  }
 0x174   : > { %1309 = vmatpush1.bf16.msra.mxu1 %v1988_v52  ;;  %1269 = vmatprep.subr.bf16.mxu0 %v1989_v53  ;;  %v2041_v52 = vld [vmem:[%s2510_s5 + $0x68] sm:$0xff]  }
 0x175   : > { %1310 = vmatprep.subr.bf16.mxu1 %v1991_v54  ;;  %v2042_v53 = vld [vmem:[%s2510_s5 + $0x28] sm:$0xff]   ;;  %v2043_v54 = vld [vmem:[%s2510_s5 + $0x60] sm:$0xff]  }
 0x177   : > { %1270 = vmatpush2.bf16.msra.mxu0 %v1993_v55  ;;  %v2044_v55 = vld [vmem:[%s2510_s5 + $0x20] sm:$0xff]  }
 0x178   : > { %1311 = vmatpush2.bf16.msra.mxu1 %v1994_v56  ;;  %1271 = vmatprep.subr.bf16.mxu0 %v1995_v57  ;;  %v2045_v56 = vld [vmem:[%s2510_s5 + $0x58] sm:$0xff]  }
 0x179   : > { %1312 = vmatprep.subr.bf16.mxu1 %v1997_v59  ;;  %v2046_v57 = vld [vmem:[%s2510_s5 + $0x18] sm:$0xff]   ;;  %v2048_v59 = vld [vmem:[%s2510_s5 + $0x10] sm:$0xff]  }
 0x17b   : > { %1272 = vmatpush2.bf16.msra.mxu0 %v1999_v60  ;;  %v2049_v60 = vld [vmem:[%s2510_s5 + $0x48] sm:$0xff]  }
 0x17c   : > { %1313 = vmatpush2.bf16.msra.mxu1 %v2000_v61  ;;  %1273 = vmatprep.subr.bf16.mxu0 %v2001_v62  ;;  %v2050_v61 = vld [vmem:[%s2510_s5 + $0x8] sm:$0xff]   ;;  %v2051_v62 = vld [vmem:[%s2510_s5 + $0x40] sm:$0xff]  }
 0x17d   : > { %1314 = vmatprep.subr.bf16.mxu1 %v2003_v0  ;;  %v2052_v0 = vld [vmem:[%s2510_s5] sm:$0xff]  }
 0x17f   : > { %1274 = vmatpush2.bf16.msra.mxu0 %v2005_v1  ;;  %v921_v1 = vld [vmem:[%s2509_s4] sm:$0x3] }
 0x180   : > { %1315 = vmatpush2.bf16.msra.mxu1 %v2006_v2  ;;  %1275 = vmatprep.subr.bf16.mxu0 %v2007_v3  ;;  %v926_v2 = vrot.slane %v921_v1, %v827_v12  ;;  %v930_v3 = vrot.slane %v921_v1, %v831_v4  ;;  %v1738_v4 = vld [vmem:[%s2511_s6] ss:$0 sm:$0xff] }
 0x181   : > { %1316 = vmatprep.subr.bf16.mxu1 %v2009_v6 }
 0x183   : > { %1276 = vmatpush2.bf16.msra.mxu0 %v2011_v7 }
 0x184   : > { %1317 = vmatpush2.bf16.msra.mxu1 %v2012_v8  ;;  %1277 = vmatprep.subr.bf16.mxu0 %v2013_v14 }
 0x185   : > { %1318 = vmatprep.subr.bf16.mxu1 %v2015_v17 }
 0x187   : > { %1278 = vmatpush2.bf16.msra.mxu0 %v2017_v18 }
 0x188   : > { %1319 = vmatpush2.bf16.msra.mxu1 %v2018_v21  ;;  %1279 = vmatprep.subr.bf16.mxu0 %v2019_v22 }
 0x189   : > { %1320 = vmatprep.subr.bf16.mxu1 %v2021_v25 }
 0x18b   : > { %1280 = vmatpush2.bf16.msra.mxu0 %v2023_v26 }
 0x18c   : > { %1321 = vmatpush2.bf16.msra.mxu1 %v2024_v27  ;;  %1281 = vmatprep.subr.bf16.mxu0 %v2025_v30 }
 0x18d   : > { %1322 = vmatprep.subr.bf16.mxu1 %v2027_v35 }
 0x18f   : > { %1282 = vmatpush2.bf16.msra.mxu0 %v2029_v36 }
 0x190   : > { %1323 = vmatpush2.bf16.msra.mxu1 %v2030_v37  ;;  %1283 = vmatprep.subr.bf16.mxu0 %v2031_v38 }
 0x191   : > { %1324 = vmatprep.subr.bf16.mxu1 %v2033_v39 }
 0x193   : > { %1284 = vmatpush2.bf16.msra.mxu0 %v2035_v44 }
 0x194   : > { %1325 = vmatpush2.bf16.msra.mxu1 %v2036_v45  ;;  %1761 = vmatprep.subr.bf16.mxu0 %v2037_v46 }
 0x196   : > { %1286 = vmatmul.mubr.bf16.vlgmr.msra.gmra.mxu0 %v853_v47 }
 0x197   : > { %1327 = vmatmul.mubr.bf16.vlgmr.msra.gmra.mxu1 %v855_v48  ;;  %1762 = vmatpush3.bf16.msra.mxu0 %v2038_v49 }
 0x198   : > { %1763 = vmatprep.subr.bf16.mxu0 %v2039_v50 }
 0x19b   : > { %1764 = vmatpush3.bf16.msra.mxu0 %v2040_v51 }
 0x19c   : > { %1765 = vmatprep.subr.bf16.mxu0 %v2041_v52 }
 0x19f   : > { %1766 = vmatpush3.bf16.msra.mxu0 %v2042_v53 }
 0x1a0   : > { %1767 = vmatprep.subr.bf16.mxu0 %v2043_v54 }
 0x1a3   : > { %1768 = vmatpush3.bf16.msra.mxu0 %v2044_v55 }
 0x1a4   : > { %1769 = vmatprep.subr.bf16.mxu0 %v2045_v56 }
 0x1a7   : > { %1770 = vmatpush3.bf16.msra.mxu0 %v2046_v57 }
 0x1a8   : > { %1771 = vmatprep.subr.bf16.mxu0 %v2047_v58 }
 0x1ab   : > { %1772 = vmatpush3.bf16.msra.mxu0 %v2048_v59 }
 0x1ac   : > { %1773 = vmatprep.subr.bf16.mxu0 %v2049_v60 }
 0x1af   : > { %1774 = vmatpush3.bf16.msra.mxu0 %v2050_v61 }
 0x1b0   : > { %1775 = vmatprep.subr.bf16.mxu0 %v2051_v62 }
 0x1b3   : > { %1776 = vmatpush3.bf16.msra.mxu0 %v2052_v0 }
 0x256   : > { %v1287_v5 = vpop.f32.mrf.mxu0 }
 0x257   : > { %v1328_v6 = vpop.f32.mrf.mxu1  ;;  %v1288_v7 = vadd.f32 %v1287_v5, %v926_v2 }
 0x258   : > { %v1289_v8 = vpop.f32.mrf.mxu0 }
 0x259   : > { %v1330_v9 = vpop.f32.mrf.mxu1  ;;  %v1329_v10 = vadd.f32 %v1328_v6, %v1288_v7  ;;  %v1290_v11 = vadd.f32 %v1289_v8, %v930_v3 }
 0x25a   : > { %v1291_v13 = vpop.f32.mrf.mxu0 }
 0x25b   : > { %v1332_v14 = vpop.f32.mrf.mxu1  ;;  %v1331_v15 = vadd.f32 %v1330_v9, %v1290_v11  ;;  %v1335_v16 = vmax.f32 %v1329_v10, 0.0 }
 0x25c   : > { %v1292_v17 = vpop.f32.mrf.mxu0 }
 0x25d   : > { %v1333_v18 = vpop.f32.mrf.mxu1  ;;  %v1336_v19 = vmax.f32 %v1331_v15, 0.0  ;;  %v1337_v21 = vpack.c.bf16 %v1335_v16, %v1335_v16 }
 0x25f   : > { %v1338_v20 = vpack.c.bf16 %v1336_v19, %v1336_v19 }
 0x261   : > { %1506 = vmatprep.mubr.bf16.mxu0 %v1338_v20 }
 0x262   : > { %1507 = vmatmul.mubr.bf16.vlgmr.msra.gmra.mxu0 %v1337_v21 }
 0x322   : > { %v1777_v63 = vpop.f32.mrf.mxu0 }
 0x324   : > { %v1778_v12 = vpop.f32.mrf.mxu0 }
 0x325   : > { %v1779_v22 = vadd.f32 %v1778_v12, %v1777_v63 }
 0x326   : > { %v1780_v23 = vpop.f32.mrf.mxu0 }
 0x327   : > { %v1509_v24 = vadd.f32 %v1779_v22, %v1738_v4 }
 0x328   : > { %v1781_v25 = vpop.f32.mrf.mxu0 }
 0x329   : > { %1515 = vst.msk [vmem:[#allocation8] sm:$0xff] %vm1514_vm0, %v1509_v24 }
 0x32a PF: > { %p1804_p7 = scmp.eq.s32.totalorder %s2242_s28, 3  ;;  %s2182_s18 = smov [#allocation8]  }
 0x32b   : > { %s1523_s20 = sshll.u32 %s2182_s18, 4  ;;  %s1524_s20 = int_to_ptr.vmem [resolvable:$true] %s1523_s20 }
 0x32c   : > { %s2107_s21 = scalar_lea.vmem %s1524_s20, 128  ;;  %p2114_p12 = scmp.lt.s32.totalorder %s1524_s20, %s1524_s20 }
 0x32d   : > { %p2108_p9 = scmp.ne.s32.totalorder %s1524_s20, %s2107_s21  ;;  %p2115_p13 = scmp.lt.s32.totalorder %s2107_s21, %s2107_s21 }
 0x32f   : > { %p2109_p10 = pnand %p2108_p9, %p1804_p7  ;;  %p2116_p2 = por %p2115_p13, %p2114_p12 }
 0x331   : > { %p2110_p11 = pneg %p2109_p10 }
 0x333   : > { %p2117_p0 = pnand %p2116_p2, %p2110_p11 }
 0x335   : > { %2120 = shalt.err (!%p2117_p0)
}
 0x336   : > { %1790 = dma.vmem_to_hbm [thread:$0]  (%p1804_p7), %s1524_s20, 128, %s2512_s7, [#allocation5]  }
 0x337   : > { %2156 = dma.done.wait (%p1804_p7), [#allocation5], 128  }
 0x338   : > { %2158 = vsyncadd (%p1804_p7), [#allocation5], 4294967168 }
 0x339 PF: > { %p19_p1 = scmp.ge.s32.totalorder %s2268_s11, 6   ;;  %s2525_s24 = smov %s2165_s25 }
 0x33a   : > { %s2526_s25 = smov %s2169_s26  ;;  %s2527_s26 = smov %s2285_s19 }
 0x33b   : > { %s2528_s27 = smov %s2268_s11  ;;  %21 = sbr.rel (!%p19_p1) target bundleno = 5 (0x5), region = 100 }
 0x340   :  { %1536 = vsyncpa [#allocation4], 1 }
 0x341   :  { %1538 = vsyncpa [#allocation4 + $0x1], 1 }
 0x342   :  { %1539 = vsyncpa [#allocation7], 1 }
 0x343   :  { %1540 = vsyncpa [#allocation5], 1 }
 0x344   :  { %1542 = vsyncpa [#allocation5 + $0x1], 1 }

</bundles_post_ra>
